<compile_context>
chip_gen: v7x
topology: tpu7x:2x2x1
jax: 0.10.0
libtpu: 0.0.40
codegen_flags: <defaults>
</compile_context>

<pallas_src>
import functools

import jax
import jax.numpy as jnp
from jax.experimental import pallas as pl
from jax.experimental.pallas import tpu as pltpu


# ---------------------------------------------------------------------------
# Fused Pallas kernel: BN affine + ReLU + 2x2 avg-pool + 1x1-conv GEMM
# ---------------------------------------------------------------------------

def _transition_kernel(x_ref, s_ref, b_ref, w_ref, o_ref, *, c, fold_wpair):
    """x_ref: (tr, 2, Wo, 2C) bf16 -- (pooled-row, h-in-pair, pooled-col,
                                       [channels of even-w pixel | odd-w pixel])
       s_ref, b_ref: (1, 2C) f32   -- folded BN scale / shift, duplicated per W-pair
       w_ref: (2C, Cout) or (C, Cout) bf16 -- 1x1 conv weight, 0.25 pre-folded
       o_ref: (tr*Wo, Cout) bf16
    """
    tr, _, wo, c2 = x_ref.shape

    s = s_ref[...].reshape(1, 1, 1, c2)
    b = b_ref[...].reshape(1, 1, 1, c2)

    # Folded BatchNorm (inference) + ReLU; f32 in-register (bf16-VPU-free on
    # v5e; mem-bound kernel so the VALU slack covers it on v6e/v7x too).
    y = jnp.maximum(x_ref[...].astype(jnp.float32) * s + b, 0.0)  # (tr,2,wo,2C)

    # H-pair of the 2x2 average pool: leading-dim add (cheap vreg select).
    yh = y[:, 0] + y[:, 1]                                         # (tr, wo, 2C)

    if fold_wpair:
        # W-pair pooling folded into the GEMM K axis (K = 2C): v6e/v7x MXUs are
        # 256 deep, so no extra MXU passes; removes a full-tile VPU add+mul.
        a = yh.reshape(tr * wo, c2).astype(jnp.bfloat16)
    else:
        # v5e path (128-deep MXU): pooled K = C GEMM.  Lane-aligned halves when
        # C % 128 == 0 (still correct otherwise, just triggers relayouts).
        p = yh[:, :, :c] + yh[:, :, c:]
        a = p.reshape(tr * wo, c).astype(jnp.bfloat16)

    acc = jnp.dot(a, w_ref[...], preferred_element_type=jnp.float32)
    o_ref[...] = acc.astype(o_ref.dtype)


# ---------------------------------------------------------------------------
# Wrapper (channels-last / NHWC in, NHWC out)
# ---------------------------------------------------------------------------

def transition_forward(x_nhwc, params, *, eps=1e-5, fold_wpair_into_gemm=True,
                       out_dtype=jnp.bfloat16,
                       vmem_budget_bytes=12 * 1024 * 1024):
    """Transition.forward on channels-last activations: NHWC in -> NHWC out.

    Math is identical to the PyTorch module (avg_pool2d(conv1x1(relu(bn(x))),2));
    pooling is applied before the (linear, per-pixel) 1x1 conv, which is exact.
    Set fold_wpair_into_gemm=False on v5e.
    """
    N, H, W, Cin = x_nhwc.shape
    assert H % 2 == 0 and W % 2 == 0, "avg_pool2d(2) expects even spatial dims"
    Cout = params["conv_w"].shape[0]
    Ho, Wo = H // 2, W // 2
    M2 = N * Ho

    # bf16 activation stream; free (metadata-only) reshape of contiguous NHWC
    # exposing the 2x2 pooling window: (N, H, W, C) -> (N*Ho, 2, Wo, 2*C).
    x2 = x_nhwc.astype(jnp.bfloat16).reshape(M2, 2, Wo, 2 * Cin)

    # Fold BatchNorm (inference) into a per-channel affine, duplicated to match
    # the [even-w | odd-w] channel layout of x2.
    scale = params["gamma"] * jax.lax.rsqrt(params["var"] + eps)
    shift = params["beta"] - params["mean"] * scale
    scale2 = jnp.concatenate([scale, scale]).reshape(1, 2 * Cin).astype(jnp.float32)
    shift2 = jnp.concatenate([shift, shift]).reshape(1, 2 * Cin).astype(jnp.float32)

    # 1x1 conv weight (Cout, Cin, 1, 1) -> GEMM RHS, pool's 0.25 pre-folded,
    # pre-cast to bf16 once.
    wm = params["conv_w"][:, :, 0, 0].T * 0.25                      # (Cin, Cout)
    if fold_wpair_into_gemm:
        w = jnp.concatenate([wm, wm], axis=0).astype(jnp.bfloat16)   # (2Cin, Cout)
    else:
        w = wm.astype(jnp.bfloat16)                                  # (Cin, Cout)

    # Row tile from a double-buffered VMEM budget; keep the output block's
    # sublane dim (tr*Wo) a multiple of 8, and leave >=2 grid steps so the
    # "parallel" axis can shard across v7x's two TensorCores.
    in_row = 2 * Wo * 2 * Cin * 2                      # bf16 bytes / pooled row
    out_row = Wo * Cout * jnp.dtype(out_dtype).itemsize
    rows_cap = max(1, vmem_budget_bytes // (2 * (in_row + out_row)))
    target = min(M2, rows_cap, max(1, M2 // 2) if M2 >= 2 else M2)
    tr = None
    for cand in range(target, 0, -1):
        if M2 % cand == 0 and (cand * Wo) % 8 == 0:
            tr = cand
            break
    if tr is None:
        tr = M2   # full-extent block: exempt from the (8,128) sublane rule

    kernel = functools.partial(_transition_kernel, c=Cin,
                               fold_wpair=fold_wpair_into_gemm)
    out_flat = pl.pallas_call(
        kernel,
        out_shape=jax.ShapeDtypeStruct((M2 * Wo, Cout), out_dtype),
        grid=(M2 // tr,),
        in_specs=[
            # If profiling shows exposed input DMA, add
            # pipeline_mode=pl.Buffered(3) here (keep VMEM headroom on v7x).
            pl.BlockSpec((tr, 2, Wo, 2 * Cin), lambda i: (i, 0, 0, 0)),
            pl.BlockSpec((1, 2 * Cin), lambda i: (0, 0)),
            pl.BlockSpec((1, 2 * Cin), lambda i: (0, 0)),
            pl.BlockSpec(w.shape, lambda i: (0, 0)),
        ],
        out_specs=pl.BlockSpec((tr * Wo, Cout), lambda i: (i, 0)),
        compiler_params=pltpu.CompilerParams(
            dimension_semantics=("parallel",),
            vmem_limit_bytes=32 * 1024 * 1024),
    )(x2, scale2, shift2, w)

    return out_flat.reshape(N, Ho, Wo, Cout)           # NHWC out


def transition_forward_nchw(x_nchw, params, **kw):
    """Adapter ONLY for callers that truly hold NCHW tensors (pays one layout
    transpose each way).  Prefer `transition_forward` with channels-last
    activations propagated from the producer layer."""
    out = transition_forward(jnp.transpose(x_nchw, (0, 2, 3, 1)), params, **kw)
    return jnp.transpose(out, (0, 3, 1, 2))


# ---------------------------------------------------------------------------
# Pure-JAX reference (literal PyTorch order: conv then pool, inference-mode BN)
# ---------------------------------------------------------------------------

def transition_reference(x_nhwc, params, *, eps=1e-5):
    xf = x_nhwc.astype(jnp.float32)
    scale = params["gamma"] * jax.lax.rsqrt(params["var"] + eps)
    shift = params["beta"] - params["mean"] * scale
    y = jnp.maximum(xf * scale + shift, 0.0)
    w = params["conv_w"][:, :, 0, 0]                   # (Cout, Cin)
    z = jnp.einsum("nhwc,oc->nhwo", y, w)              # 1x1 conv, no bias
    N, H, W, Co = z.shape
    return z.reshape(N, H // 2, 2, W // 2, 2, Co).mean(axis=(2, 4))


# ---------------------------------------------------------------------------
# Deterministic parameters
# ---------------------------------------------------------------------------

def make_params(key, in_planes, out_planes):
    ks = jax.random.split(key, 5)
    return {
        "gamma": 1.0 + 0.1 * jax.random.normal(ks[0], (in_planes,), jnp.float32),
        "beta": 0.1 * jax.random.normal(ks[1], (in_planes,), jnp.float32),
        "mean": 0.1 * jax.random.normal(ks[2], (in_planes,), jnp.float32),
        "var": 0.5 + jnp.abs(jax.random.normal(ks[3], (in_planes,), jnp.float32)),
        "conv_w": 0.05 * jax.random.normal(
            ks[4], (out_planes, in_planes, 1, 1), jnp.float32),
    }


# ---------------------------------------------------------------------------

if __name__ == "__main__":
    key = jax.random.PRNGKey(0)
    pkey, xkey = jax.random.split(key)

    # Transition(in_planes=128, out_planes=64) at batch=2, 16x16 spatial.
    # Activations arrive channels-last in bf16 (producer-layer layout) -- no
    # NCHW<->NHWC HBM round-trip on the hot path.
    N, Cin, Cout, H, W = 2, 128, 64, 16, 16
    params = make_params(pkey, Cin, Cout)
    x = jax.random.normal(xkey, (N, H, W, Cin), jnp.float32).astype(jnp.bfloat16)

    fwd = jax.jit(transition_forward)
    out = fwd(x, params)
    jax.block_until_ready(out)

    assert out.shape == (N, H // 2, W // 2, Cout), out.shape
    assert out.dtype == jnp.bfloat16, out.dtype
    assert bool(jnp.all(jnp.isfinite(out.astype(jnp.float32))))

    ref = transition_reference(x, params)
    max_err = float(jnp.max(jnp.abs(out.astype(jnp.float32) - ref)))
    assert max_err < 3e-2, f"max abs error {max_err}"

    print("KERNEL_OK")
</pallas_src>

<mosaic_0001>
module attributes {stable_mosaic.version = 11 : i64} {
  func.func @_transition_kernel(%arg0: i32, %arg1: memref<8x2x8x256xbf16, #tpu.memory_space<vmem>>, %arg2: memref<1x256xf32, #tpu.memory_space<vmem>>, %arg3: memref<1x256xf32, #tpu.memory_space<vmem>>, %arg4: memref<256x64xbf16, #tpu.memory_space<vmem>>, %arg5: memref<64x64xbf16, #tpu.memory_space<vmem>>) attributes {dimension_semantics = [#tpu.dimension_semantics<parallel>], iteration_bounds = array<i64: 2>, scalar_prefetch = 0 : i64, scratch_operands = 0 : i64, tpu.core_type = #tpu.core_type<tc>, window_params = [{transform_indices = @transform_0, window_bounds = array<i64: 8, 2, 8, 256>}, {pipeline_mode = #tpu.pipeline_mode<synchronous>, transform_indices = @transform_1, window_bounds = array<i64: 1, 256>}, {pipeline_mode = #tpu.pipeline_mode<synchronous>, transform_indices = @transform_2, window_bounds = array<i64: 1, 256>}, {pipeline_mode = #tpu.pipeline_mode<synchronous>, transform_indices = @transform_3, window_bounds = array<i64: 256, 64>}, {transform_indices = @transform_4, window_bounds = array<i64: 64, 64>}]} {
    %c0 = arith.constant 0 : index
    %c0_0 = arith.constant 0 : index
    %0 = vector.load %arg2[%c0, %c0_0] : memref<1x256xf32, #tpu.memory_space<vmem>>, vector<1x256xf32>
    %1 = vector.shape_cast %0 : vector<1x256xf32> to vector<1x1x1x256xf32>
    %c0_1 = arith.constant 0 : index
    %c0_2 = arith.constant 0 : index
    %2 = vector.load %arg3[%c0_1, %c0_2] : memref<1x256xf32, #tpu.memory_space<vmem>>, vector<1x256xf32>
    %3 = vector.shape_cast %2 : vector<1x256xf32> to vector<1x1x1x256xf32>
    %c0_3 = arith.constant 0 : index
    %c0_4 = arith.constant 0 : index
    %c0_5 = arith.constant 0 : index
    %c0_6 = arith.constant 0 : index
    %4 = vector.load %arg1[%c0_3, %c0_4, %c0_5, %c0_6] : memref<8x2x8x256xbf16, #tpu.memory_space<vmem>>, vector<8x2x8x256xbf16>
    %5 = arith.extf %4 : vector<8x2x8x256xbf16> to vector<8x2x8x256xf32>
    %6 = vector.broadcast %1 : vector<1x1x1x256xf32> to vector<8x2x8x256xf32>
    %7 = arith.mulf %5, %6 : vector<8x2x8x256xf32>
    %8 = vector.broadcast %3 : vector<1x1x1x256xf32> to vector<8x2x8x256xf32>
    %9 = arith.addf %7, %8 : vector<8x2x8x256xf32>
    %cst = arith.constant 0.000000e+00 : f32
    %10 = vector.broadcast %cst : f32 to vector<8x2x8x256xf32>
    %11 = arith.maximumf %9, %10 : vector<8x2x8x256xf32>
    %12 = vector.extract_strided_slice %11 {offsets = [0, 0, 0, 0], sizes = [8, 1, 8, 256], strides = [1, 1, 1, 1]} : vector<8x2x8x256xf32> to vector<8x1x8x256xf32>
    %13 = vector.shape_cast %12 : vector<8x1x8x256xf32> to vector<8x8x256xf32>
    %14 = vector.extract_strided_slice %11 {offsets = [0, 1, 0, 0], sizes = [8, 1, 8, 256], strides = [1, 1, 1, 1]} : vector<8x2x8x256xf32> to vector<8x1x8x256xf32>
    %15 = vector.shape_cast %14 : vector<8x1x8x256xf32> to vector<8x8x256xf32>
    %16 = arith.addf %13, %15 : vector<8x8x256xf32>
    %17 = vector.shape_cast %16 : vector<8x8x256xf32> to vector<64x256xf32>
    %18 = arith.truncf %17 : vector<64x256xf32> to vector<64x256xbf16>
    %c0_7 = arith.constant 0 : index
    %c0_8 = arith.constant 0 : index
    %19 = vector.load %arg4[%c0_7, %c0_8] : memref<256x64xbf16, #tpu.memory_space<vmem>>, vector<256x64xbf16>
    %cst_9 = arith.constant dense<0.000000e+00> : vector<64x64xf32>
    %20 = tpu.matmul %18, %19, %cst_9 {dimension_numbers = #tpu.dot_dimension_numbers<[1], [0], [0], [1], [0, 0, 1, 1], [], []>} : vector<64x256xbf16>, vector<256x64xbf16>, vector<64x64xf32> -> vector<64x64xf32>
    %21 = arith.truncf %20 : vector<64x64xf32> to vector<64x64xbf16>
    %c0_10 = arith.constant 0 : index
    %c0_11 = arith.constant 0 : index
    %22 = vector.load %arg5[%c0_10, %c0_11] : memref<64x64xbf16, #tpu.memory_space<vmem>>, vector<64x64xbf16>
    tpu.vector_store %arg5[%c0_10, %c0_11], %21 {strides = array<i32>} : memref<64x64xbf16, #tpu.memory_space<vmem>>, vector<64x64xbf16>,
    return
  }
  func.func @transform_0(%arg0: i32) -> (i32, i32, i32, i32) {
    %c0_i32 = arith.constant 0 : i32
    %c0_i32_0 = arith.constant 0 : i32
    %c0_i32_1 = arith.constant 0 : i32
    %c0_i32_2 = arith.constant 0 : i32
    return %arg0, %c0_i32, %c0_i32_0, %c0_i32_1 : i32, i32, i32, i32
  }
  func.func @transform_1(%arg0: i32) -> (i32, i32) {
    %c0_i32 = arith.constant 0 : i32
    %c0_i32_0 = arith.constant 0 : i32
    %c0_i32_1 = arith.constant 0 : i32
    return %c0_i32, %c0_i32_0 : i32, i32
  }
  func.func @transform_2(%arg0: i32) -> (i32, i32) {
    %c0_i32 = arith.constant 0 : i32
    %c0_i32_0 = arith.constant 0 : i32
    %c0_i32_1 = arith.constant 0 : i32
    return %c0_i32, %c0_i32_0 : i32, i32
  }
  func.func @transform_3(%arg0: i32) -> (i32, i32) {
    %c0_i32 = arith.constant 0 : i32
    %c0_i32_0 = arith.constant 0 : i32
    %c0_i32_1 = arith.constant 0 : i32
    return %c0_i32, %c0_i32_0 : i32, i32
  }
  func.func @transform_4(%arg0: i32) -> (i32, i32) {
    %c0_i32 = arith.constant 0 : i32
    %c0_i32_0 = arith.constant 0 : i32
    return %arg0, %c0_i32 : i32, i32
  }
}

</mosaic_0001>

<bundles_post_ra>
// kernel: transition_forward.1
= control target key start
LH: loop header
LB: loop body
LE: loop exit
PB: predicated region body
PF: predicated region fallthrough
CT: control target
= control target key end

     0   :  { %9 = vsyncpa [#allocation3], 0  ;;  %s1282_s0 = inlined_call_operand.vmem [shape: bf16[16,2,8,256], index: 0, kind: input, shape index: {}]   ;;  %s1283_s1 = inlined_call_operand.vmem [shape: f32[1,256], index: 1, kind: input, shape index: {}]   ;;  %s1284_s2 = inlined_call_operand.vmem [shape: f32[1,256], index: 2, kind: input, shape index: {}]   ;;  %s1285_s3 = inlined_call_operand.vmem [shape: bf16[256,64], index: 3, kind: input, shape index: {}]   ;;  %s1286_s4 = inlined_call_operand.hbm [shape: bf16[128,64], index: 4, kind: output, shape index: {}]  }
   0x1   :  { %11 = vsyncpa [#allocation3 + $0x1], 0  ;;  %s957_s15 = smov 0   ;;  %s959_s16 = smov 0  }
   0x2   :  { %s961_s17 = smov 0   ;;  %s963_s18 = smov 0  }
   0x3 LB: > { %s978_s19 = sadd.s32 4294967295, %s927_s18   ;;  %s705_s20 = sadd.s32 4294967294, %s927_s18   ;;  %s927_s18 = sphi %s963_s18, %s1292_s18   ;;  %s923_s17 = sphi %s961_s17, %s1291_s17   ;;  %s919_s16 = sphi %s959_s16, %s1290_s16   ;;  %s915_s15 = sphi %s957_s15, %s1289_s15  }
   0x4   : > { %s982_s21 = sadd.s32 1, %s927_s18   ;;  %s113_s22 = sadd.s32 1, %s923_s17 }
   0x5   : > { %s110_s23 = ssub.s32 %s927_s18, %s982_s21  ;;  %p123_p0 = scmp.ne.s32.totalorder %s923_s17, %s919_s16 }
   0x6   : > { %p111_p1 = scmp.eq.s32.totalorder %s110_s23, 0  ;;  %p124_p2 = scmp.eq.s32.totalorder %s978_s19, 1 }
   0x7   : > { %p129_p3 = scmp.ne.s32.totalorder %s919_s16, %s915_s15  ;;  %p130_p4 = scmp.eq.s32.totalorder %s705_s20, 1 }
   0x8   : > { %s993_s24 = scalar_select %p111_p1, %s923_s17, %s113_s22  }
   0x9   : > { %p995_p5 = por %p124_p2, %p123_p0  ;;  %p999_p6 = por %p130_p4, %p129_p3 }
   0xa   : > { %p708_p7 = scmp.ge.s32.totalorder %s927_s18, 1  ;;  %p167_p8 = scmp.lt.s32.totalorder %s927_s18, 3 }
   0xc   : > { %p168_p9 = pnand %p708_p7, %p167_p8 }
   0xd   : > { %v849_v0 = vld [vmem:[%s1285_s3 + $0x40] sm:$0xff] (!%p168_p9)   ;;  %s710_s29 = sshll.u32 (!%p168_p9), %s978_s19, 3  ;;  %v851_v2 = vld [vmem:[%s1285_s3 + $0x48] sm:$0xff] (!%p168_p9)   ;;  %v853_v4 = vld [vmem:[%s1285_s3 + $0x50] sm:$0xff] (!%p168_p9)   ;;  %v254_v5 = vlaneseq (!%p168_p9)  ;;  %vm620_vm0 = vcmask (!%p168_p9), 519168   ;;  %s751_s11 = sshll.u32 (!%p168_p9), %s978_s19, 9 }
   0xe   : > { %171 = sbr.rel (%p168_p9) target bundleno = 303 (0x12f), region = 36  ;;  %v850_v1 = vld [vmem:[%s1285_s3] sm:$0xff] (!%p168_p9)   ;;  %752 = vmatprep.subr.bf16.mxu0 (!%p168_p9), %v849_v0  ;;  %792 = vmatprep.subr.bf16.mxu1 (!%p168_p9), %v849_v0  ;;  %p195_p10 = scmp.lt.s32.totalorder (!%p168_p9), %s710_s29, 15  ;;  %v852_v3 = vld [vmem:[%s1285_s3 + $0x8] sm:$0xff] (!%p168_p9)   ;;  %v854_v6 = vld [vmem:[%s1285_s3 + $0x10] sm:$0xff] (!%p168_p9)  }
   0xf   : > { %753 = vmatpush3.bf16.msra.mxu0 (!%p168_p9), %v850_v1  ;;  %800 = vmatpush3.bf16.msra.mxu1 (!%p168_p9), %v850_v1  ;;  %v855_v7 = vld [vmem:[%s1285_s3 + $0x58] sm:$0xff] (!%p168_p9)   ;;  %v255_v8 = vshrl.u32 (!%p168_p9), %v254_v5, 7  ;;  %v857_v10 = vld [vmem:[%s1285_s3 + $0x60] sm:$0xff] (!%p168_p9)   ;;  %v859_v14 = vld [vmem:[%s1285_s3 + $0x68] sm:$0xff] (!%p168_p9)   ;;  %s1231_s20 = scalar_lea.hbm (!%p168_p9), %s1286_s4, %s751_s11  ;;  %s929_s23 = smov (!%p168_p9), [#allocation2]  }
  0x10   : > { %754 = vmatprep.subr.bf16.mxu0 (!%p168_p9), %v851_v2  ;;  %793 = vmatprep.subr.bf16.mxu1 (!%p168_p9), %v851_v2  ;;  %v856_v9 = vld [vmem:[%s1285_s3 + $0x18] sm:$0xff] (!%p168_p9)   ;;  %v858_v13 = vld [vmem:[%s1285_s3 + $0x20] sm:$0xff] (!%p168_p9)   ;;  %v860_v31 = vld [vmem:[%s1285_s3 + $0x28] sm:$0xff] (!%p168_p9)   ;;  %s869_s27 = sshll.u32 (!%p168_p9), %s929_s23, 4  ;;  %s870_s27 = int_to_ptr.vmem [resolvable:$false] %s869_s27 }
  0x11   : > { %v256_v11 = vsub.s32 (!%p168_p9), 0, %v255_v8  ;;  %v260_v12 = vsub.s32 (!%p168_p9), 1, %v255_v8  ;;  %v203_v15 = vld [vmem:[%s1283_s1] sm:$0x3] (!%p168_p9)  ;;  %v861_v37 = vld [vmem:[%s1285_s3 + $0x70] sm:$0xff] (!%p168_p9)   ;;  %v863_v56 = vld [vmem:[%s1285_s3 + $0x78] sm:$0xff] (!%p168_p9)  }
  0x12   : > { %v204_v16 = vld [vmem:[%s1284_s2] sm:$0x3] (!%p168_p9)  ;;  %v862_v51 = vld [vmem:[%s1285_s3 + $0x30] sm:$0xff] (!%p168_p9)   ;;  %s871_s28 = scalar_lea.vmem (!%p168_p9), %s870_s27, 1024 }
  0x13   : > { %755 = vmatpush3.bf16.msra.mxu0 (!%p168_p9), %v852_v3  ;;  %801 = vmatpush3.bf16.msra.mxu1 (!%p168_p9), %v852_v3  ;;  %v1058_v23 = vrot.slane (!%p168_p9), %v203_v15, %v256_v11  ;;  %v1060_v24 = vrot.slane (!%p168_p9), %v203_v15, %v260_v12  ;;  %v1076_v35 = vrot.slane (!%p168_p9), %v204_v16, %v256_v11 }
  0x14   : > { %756 = vmatprep.subr.bf16.mxu0 (!%p168_p9), %v853_v4  ;;  %794 = vmatprep.subr.bf16.mxu1 (!%p168_p9), %v853_v4  ;;  %v1086_v40 = vrot.slane (!%p168_p9), %v204_v16, %v260_v12 }
  0x15   : > { %s1294_s29 = smov (!%p195_p10, %s710_s29), 15 }
  0x16   : > { %s742_s22 = sshll.u32 %s1294_s29, 4 }
  0x17   : > { %757 = vmatpush3.bf16.msra.mxu0 %v854_v6  ;;  %802 = vmatpush3.bf16.msra.mxu1 %v854_v6  ;;  %s1036_s7 = scalar_lea.vmem %s1282_s0, %s742_s22  ;;  %v864_v6 = vld [vmem:[%s1285_s3 + $0x38] sm:$0xff]  }
  0x18   : > { %758 = vmatprep.subr.bf16.mxu0 %v855_v7  ;;  %795 = vmatprep.subr.bf16.mxu1 %v855_v7  ;;  %v205_v17 = vld [vmem:[%s1036_s7] sm:$0xff]  ;;  %v206_v18 = vld [vmem:[%s1036_s7 + $0x8] sm:$0xff]  ;;  %v1053_v19 = vld [vmem:[%s1036_s7 + $0x10] sm:$0xff] }
  0x19   : > { %v1056_v20 = vld [vmem:[%s1036_s7 + $0x18] sm:$0xff]  ;;  %v221_v21 = vunpack.c.l.bf16 %v205_v17  ;;  %v222_v22 = vunpack.c.h.bf16 %v205_v17  ;;  %v223_v25 = vunpack.c.l.bf16 %v206_v18  ;;  %v224_v26 = vunpack.c.h.bf16 %v206_v18  ;;  %v1065_v29 = vld [vmem:[%s1036_s7 + $0x40] sm:$0xff]  ;;  %v1068_v30 = vld [vmem:[%s1036_s7 + $0x48] sm:$0xff] }
  0x1a   : > { %v225_v27 = vunpack.c.l.bf16 %v1053_v19  ;;  %v226_v28 = vunpack.c.h.bf16 %v1053_v19  ;;  %v227_v32 = vunpack.c.l.bf16 %v1056_v20  ;;  %v228_v33 = vunpack.c.h.bf16 %v1056_v20  ;;  %v1079_v36 = vld [vmem:[%s1036_s7 + $0x50] sm:$0xff]  ;;  %v1089_v41 = vld [vmem:[%s1036_s7 + $0x58] sm:$0xff]  ;;  %v1112_v61 = vld [vmem:[%s1036_s7 + $0x20] sm:$0xff] }
  0x1b   : > { %759 = vmatpush3.bf16.msra.mxu0 %v856_v9  ;;  %803 = vmatpush3.bf16.msra.mxu1 %v856_v9  ;;  %v265_v34 = vmul.f32 %v1060_v24, %v222_v22  ;;  %v267_v38 = vmul.f32 %v1060_v24, %v224_v26  ;;  %v237_v42 = vunpack.c.l.bf16 %v1065_v29  ;;  %v238_v44 = vunpack.c.h.bf16 %v1065_v29  ;;  %v1136_v29 = vld [vmem:[%s1036_s7 + $0x28] sm:$0xff] }
  0x1c   : > { %760 = vmatprep.subr.bf16.mxu0 %v857_v10  ;;  %796 = vmatprep.subr.bf16.mxu1 %v857_v10  ;;  %v269_v39 = vmul.f32 %v1060_v24, %v226_v28  ;;  %v271_v43 = vmul.f32 %v1060_v24, %v228_v33  ;;  %v239_v45 = vunpack.c.l.bf16 %v1068_v30  ;;  %v240_v46 = vunpack.c.h.bf16 %v1068_v30 }
  0x1d   : > { %v308_v47 = vadd.f32 %v1086_v40, %v265_v34  ;;  %v310_v48 = vadd.f32 %v1086_v40, %v267_v38  ;;  %v241_v50 = vunpack.c.l.bf16 %v1079_v36  ;;  %v242_v53 = vunpack.c.h.bf16 %v1079_v36 }
  0x1e   : > { %v312_v49 = vadd.f32 %v1086_v40, %v269_v39  ;;  %v314_v52 = vadd.f32 %v1086_v40, %v271_v43  ;;  %v243_v54 = vunpack.c.l.bf16 %v1089_v41  ;;  %v244_v55 = vunpack.c.h.bf16 %v1089_v41  ;;  %v1143_v39 = vld [vmem:[%s1036_s7 + $0x30] sm:$0xff]  ;;  %v1146_v41 = vld [vmem:[%s1036_s7 + $0x38] sm:$0xff] }
  0x1f   : > { %761 = vmatpush3.bf16.msra.mxu0 %v858_v13  ;;  %804 = vmatpush3.bf16.msra.mxu1 %v858_v13  ;;  %v340_v57 = vmax.f32 %v308_v47, 0.0  ;;  %v342_v58 = vmax.f32 %v310_v48, 0.0  ;;  %v281_v60 = vmul.f32 %v1060_v24, %v238_v44  ;;  %v283_v63 = vmul.f32 %v1060_v24, %v240_v46 }
  0x20   : > { %762 = vmatprep.subr.bf16.mxu0 %v859_v14  ;;  %797 = vmatprep.subr.bf16.mxu1 %v859_v14  ;;  %v344_v59 = vmax.f32 %v312_v49, 0.0  ;;  %v346_v62 = vmax.f32 %v314_v52, 0.0  ;;  %v285_v0 = vmul.f32 %v1060_v24, %v242_v53  ;;  %v287_v1 = vmul.f32 %v1060_v24, %v244_v55  ;;  %v1158_v55 = vld [vmem:[%s1036_s7 + $0x68] sm:$0xff] }
  0x21   : > { %v372_v2 = vadd.f32 %v342_v58, %v340_v57  ;;  %v324_v3 = vadd.f32 %v1086_v40, %v281_v60  ;;  %v264_v4 = vmul.f32 %v1058_v23, %v221_v21  ;;  %v266_v5 = vmul.f32 %v1058_v23, %v223_v25 }
  0x22   : > { %v374_v7 = vadd.f32 %v346_v62, %v344_v59  ;;  %v326_v8 = vadd.f32 %v1086_v40, %v283_v63  ;;  %v328_v9 = vadd.f32 %v1086_v40, %v285_v0  ;;  %v230_v10 = vunpack.c.h.bf16 %v1112_v61  ;;  %v1165_v62 = vld [vmem:[%s1036_s7 + $0x78] sm:$0xff] }
  0x23   : > { %763 = vmatpush3.bf16.msra.mxu0 %v860_v31  ;;  %805 = vmatpush3.bf16.msra.mxu1 %v860_v31  ;;  %v330_v11 = vadd.f32 %v1086_v40, %v287_v1  ;;  %v356_v12 = vmax.f32 %v324_v3, 0.0  ;;  %v268_v13 = vmul.f32 %v1058_v23, %v225_v27  ;;  %v270_v14 = vmul.f32 %v1058_v23, %v227_v32 }
  0x24   : > { %764 = vmatprep.subr.bf16.mxu0 %v861_v37  ;;  %798 = vmatprep.subr.bf16.mxu1 %v861_v37  ;;  %v388_v15 = vpack.c.bf16 %v374_v7, %v372_v2  ;;  %v358_v16 = vmax.f32 %v326_v8, 0.0  ;;  %v360_v17 = vmax.f32 %v328_v9, 0.0  ;;  %v307_v18 = vadd.f32 %v1076_v35, %v264_v4 }
  0x25   : > { %v362_v19 = vmax.f32 %v330_v11, 0.0  ;;  %v309_v20 = vadd.f32 %v1076_v35, %v266_v5  ;;  %v311_v21 = vadd.f32 %v1076_v35, %v268_v13  ;;  %v313_v22 = vadd.f32 %v1076_v35, %v270_v14 }
  0x26   : > { %v380_v25 = vadd.f32 %v358_v16, %v356_v12  ;;  %v339_v26 = vmax.f32 %v307_v18, 0.0  ;;  %v280_v27 = vmul.f32 %v1058_v23, %v237_v42  ;;  %v282_v28 = vmul.f32 %v1058_v23, %v239_v45  ;;  %555 = vmatprep.mubr.bf16.mxu0 %v388_v15 }
  0x27   : > { %765 = vmatpush3.bf16.msra.mxu0 %v862_v51  ;;  %806 = vmatpush3.bf16.msra.mxu1 %v862_v51  ;;  %v382_v30 = vadd.f32 %v362_v19, %v360_v17  ;;  %v341_v31 = vmax.f32 %v309_v20, 0.0  ;;  %v343_v32 = vmax.f32 %v311_v21, 0.0  ;;  %v345_v33 = vmax.f32 %v313_v22, 0.0 }
  0x28   : > { %766 = vmatprep.subr.bf16.mxu0 %v863_v56  ;;  %799 = vmatprep.subr.bf16.mxu1 %v863_v56  ;;  %v284_v34 = vmul.f32 %v1058_v23, %v241_v50  ;;  %v286_v36 = vmul.f32 %v1058_v23, %v243_v54  ;;  %v323_v37 = vadd.f32 %v1076_v35, %v280_v27  ;;  %v232_v45 = vunpack.c.h.bf16 %v1136_v29  ;;  %v1152_v50 = vld [vmem:[%s1036_s7 + $0x60] sm:$0xff]  ;;  %v1161_v56 = vld [vmem:[%s1036_s7 + $0x70] sm:$0xff]  ;;  %s191_s7 = sand.u32 1, %s919_s16  }
  0x29   : > { %v325_v38 = vadd.f32 %v1076_v35, %v282_v28  ;;  %v392_v42 = vpack.c.bf16 %v382_v30, %v380_v25  ;;  %v371_v43 = vadd.f32 %v341_v31, %v339_v26  ;;  %v373_v44 = vadd.f32 %v345_v33, %v343_v32  ;;  %s709_s9 = sshll.u32 %s191_s7, 5  ;;  %s1241_s19 = scalar_lea.sflag [#allocation3], %s191_s7 }
  0x2a   : > { %v327_v46 = vadd.f32 %v1076_v35, %v284_v34  ;;  %v329_v47 = vadd.f32 %v1076_v35, %v286_v36  ;;  %v355_v48 = vmax.f32 %v323_v37, 0.0  ;;  %v234_v52 = vunpack.c.h.bf16 %v1143_v39  ;;  %s1212_s10 = scalar_lea.vmem [#allocation2], %s709_s9 }
  0x2b   : > { %767 = vmatpush3.bf16.msra.mxu0 %v864_v6  ;;  %807 = vmatpush3.bf16.msra.mxu1 %v864_v6  ;;  %v357_v49 = vmax.f32 %v325_v38, 0.0  ;;  %v387_v51 = vpack.c.bf16 %v373_v44, %v371_v43  ;;  %v236_v53 = vunpack.c.h.bf16 %v1146_v41  ;;  %v273_v54 = vmul.f32 %v1060_v24, %v230_v10  ;;  %s643_s12 = sshll.u32 %s1212_s10, 4  ;;  %s1233_s12 = int_to_ptr.vmem [resolvable:$true] %s643_s12 }
  0x2c   : > { %571 = vmatprep.mubr.bf16.mxu1 %v392_v42  ;;  %v359_v57 = vmax.f32 %v327_v46, 0.0  ;;  %v361_v58 = vmax.f32 %v329_v47, 0.0  ;;  %v275_v60 = vmul.f32 %v1060_v24, %v232_v45  ;;  %v277_v63 = vmul.f32 %v1060_v24, %v234_v52  ;;  %s865_s22 = scalar_lea.vmem %s1233_s12, 512  ;;  %p872_p0 = scmp.lt.s32.totalorder %s1233_s12, %s870_s27 }
  0x2d   : > { %v379_v59 = vadd.f32 %v357_v49, %v355_v48  ;;  %v279_v0 = vmul.f32 %v1060_v24, %v236_v53  ;;  %v316_v1 = vadd.f32 %v1086_v40, %v273_v54  ;;  %v246_v2 = vunpack.c.h.bf16 %v1152_v50  ;;  %p866_p11 = scmp.ne.s32.totalorder %s1233_s12, %s865_s22  ;;  %p873_p1 = scmp.lt.s32.totalorder %s871_s28, %s865_s22 }
  0x2e   : > { %556 = vmatmul.mubr.bf16.vlgmr.msra.gmra.mrb[0].mxu0 %v387_v51  ;;  %v381_v3 = vadd.f32 %v361_v58, %v359_v57  ;;  %v318_v4 = vadd.f32 %v1086_v40, %v275_v60  ;;  %v248_v5 = vunpack.c.h.bf16 %v1158_v55  ;;  %v250_v6 = vunpack.c.h.bf16 %v1161_v56 }
  0x2f   : > { %v320_v7 = vadd.f32 %v1086_v40, %v277_v63  ;;  %v322_v8 = vadd.f32 %v1086_v40, %v279_v0  ;;  %v348_v9 = vmax.f32 %v316_v1, 0.0  ;;  %v252_v10 = vunpack.c.h.bf16 %v1165_v62  ;;  %p867_p12 = pnand %p866_p11, %p995_p5  ;;  %p874_p2 = por %p873_p1, %p872_p0 }
  0x30   : > { %v391_v11 = vpack.c.bf16 %v381_v3, %v379_v59  ;;  %v350_v12 = vmax.f32 %v318_v4, 0.0  ;;  %v289_v13 = vmul.f32 %v1060_v24, %v246_v2  ;;  %v291_v14 = vmul.f32 %v1060_v24, %v248_v5 }
  0x31   : > { %v352_v15 = vmax.f32 %v320_v7, 0.0  ;;  %v354_v16 = vmax.f32 %v322_v8, 0.0  ;;  %v293_v17 = vmul.f32 %v1060_v24, %v250_v6  ;;  %v295_v18 = vmul.f32 %v1060_v24, %v252_v10  ;;  %p868_p13 = pneg %p867_p12 }
  0x32   : > { %572 = vmatmul.mubr.bf16.vlgmr.msra.gmra.mrb[0].mxu1 %v391_v11  ;;  %v376_v19 = vadd.f32 %v350_v12, %v348_v9  ;;  %v332_v20 = vadd.f32 %v1086_v40, %v289_v13  ;;  %v334_v21 = vadd.f32 %v1086_v40, %v291_v14  ;;  %v229_v22 = vunpack.c.l.bf16 %v1112_v61 }
  0x33   : > { %v378_v25 = vadd.f32 %v354_v16, %v352_v15  ;;  %v336_v26 = vadd.f32 %v1086_v40, %v293_v17  ;;  %v338_v27 = vadd.f32 %v1086_v40, %v295_v18  ;;  %v231_v28 = vunpack.c.l.bf16 %v1136_v29  ;;  %p875_p3 = pnand %p874_p2, %p868_p13 }
  0x34   : > { %v364_v30 = vmax.f32 %v332_v20, 0.0  ;;  %v366_v31 = vmax.f32 %v334_v21, 0.0  ;;  %v233_v32 = vunpack.c.l.bf16 %v1143_v39  ;;  %v235_v24 = vunpack.c.l.bf16 %v1146_v41 }
  0x35   : > { %v390_v33 = vpack.c.bf16 %v378_v25, %v376_v19  ;;  %v368_v34 = vmax.f32 %v336_v26, 0.0  ;;  %v370_v36 = vmax.f32 %v338_v27, 0.0  ;;  %v272_v37 = vmul.f32 %v1058_v23, %v229_v22 }
  0x36   : > { %v384_v38 = vadd.f32 %v366_v31, %v364_v30  ;;  %v274_v61 = vmul.f32 %v1058_v23, %v231_v28  ;;  %v276_v42 = vmul.f32 %v1058_v23, %v233_v32  ;;  %v278_v40 = vmul.f32 %v1058_v23, %v235_v24 }
  0x37   : > { %563 = vmatprep.mubr.bf16.mxu0 %v390_v33  ;;  %v386_v29 = vadd.f32 %v370_v36, %v368_v34  ;;  %v315_v43 = vadd.f32 %v1076_v35, %v272_v37  ;;  %v245_v39 = vunpack.c.l.bf16 %v1152_v50  ;;  %v247_v41 = vunpack.c.l.bf16 %v1158_v55 }
  0x38   : > { %v317_v44 = vadd.f32 %v1076_v35, %v274_v61  ;;  %v319_v45 = vadd.f32 %v1076_v35, %v276_v42  ;;  %v321_v46 = vadd.f32 %v1076_v35, %v278_v40  ;;  %v249_v47 = vunpack.c.l.bf16 %v1161_v56 }
  0x39   : > { %v394_v48 = vpack.c.bf16 %v386_v29, %v384_v38  ;;  %v347_v49 = vmax.f32 %v315_v43, 0.0  ;;  %v251_v51 = vunpack.c.l.bf16 %v1165_v62  ;;  %v288_v52 = vmul.f32 %v1058_v23, %v245_v39 }
  0x3a   : > { %v349_v53 = vmax.f32 %v317_v44, 0.0  ;;  %v351_v54 = vmax.f32 %v319_v45, 0.0  ;;  %v353_v57 = vmax.f32 %v321_v46, 0.0  ;;  %v290_v50 = vmul.f32 %v1058_v23, %v247_v41 }
  0x3b   : > { %579 = vmatprep.mubr.bf16.mxu1 %v394_v48  ;;  %v292_v55 = vmul.f32 %v1058_v23, %v249_v47  ;;  %v294_v58 = vmul.f32 %v1058_v23, %v251_v51  ;;  %v331_v59 = vadd.f32 %v1076_v35, %v288_v52 }
  0x3c   : > { %v375_v56 = vadd.f32 %v349_v53, %v347_v49  ;;  %v377_v60 = vadd.f32 %v353_v57, %v351_v54  ;;  %v333_v62 = vadd.f32 %v1076_v35, %v290_v50 }
  0x3d   : > { %v335_v63 = vadd.f32 %v1076_v35, %v292_v55  ;;  %v337_v0 = vadd.f32 %v1076_v35, %v294_v58  ;;  %v363_v1 = vmax.f32 %v331_v59, 0.0 }
  0x3e   : > { %v389_v2 = vpack.c.bf16 %v377_v60, %v375_v56  ;;  %v365_v3 = vmax.f32 %v333_v62, 0.0 }
  0x3f   : > { %v367_v4 = vmax.f32 %v335_v63, 0.0  ;;  %v369_v5 = vmax.f32 %v337_v0, 0.0 }
  0x40   : > { %564 = vmatmul.mubr.bf16.gmra.mrb[4].mxu0 %v389_v2  ;;  %v383_v6 = vadd.f32 %v365_v3, %v363_v1 }
  0x41   : > { %v385_v23 = vadd.f32 %v369_v5, %v367_v4 }
  0x43   : > { %v393_v7 = vpack.c.bf16 %v385_v23, %v383_v6 }
  0x45   : > { %580 = vmatmul.mubr.bf16.gmra.mrb[4].mxu1 %v393_v7 }
 0x101   : > { %v768_v8 = vpop.f32.mrb[0].mxu0 }
 0x102   : > { %v769_v9 = vpop.f32.mrb[1].mxu0 }
 0x103   : > { %v770_v10 = vadd.f32 %v769_v9, %v768_v8  ;;  %v771_v11 = vpop.f32.mrb[2].mxu0 }
 0x104   : > { %v772_v12 = vpop.f32.mrb[3].mxu0 }
 0x105   : > { %v743_v35 = vpack.c.bf16 %v770_v10, %v770_v10  ;;  %v773_v13 = vadd.f32 %v772_v12, %v771_v11  ;;  %v780_v14 = vpop.f32.mrb[0].mxu1 }
 0x106   : > { %v781_v15 = vpop.f32.mrb[1].mxu1 }
 0x107   : > { %621 = vst.msk [vmem:[%s1212_s10] sm:$0xf] %vm620_vm0, %v743_v35  ;;  %v744_v16 = vpack.c.bf16 %v773_v13, %v773_v13  ;;  %v782_v17 = vadd.f32 %v781_v15, %v780_v14  ;;  %v783_v18 = vpop.f32.mrb[2].mxu1 }
 0x108   : > { %v784_v19 = vpop.f32.mrb[3].mxu1 }
 0x109   : > { %622 = vst.msk [vmem:[%s1212_s10 + $0x4] sm:$0xf] %vm620_vm0, %v744_v16  ;;  %v747_v20 = vpack.c.bf16 %v782_v17, %v782_v17  ;;  %v785_v21 = vadd.f32 %v784_v19, %v783_v18 }
 0x10b   : > { %625 = vst.msk [vmem:[%s1212_s10 + $0x10] sm:$0xf] %vm620_vm0, %v747_v20  ;;  %v748_v22 = vpack.c.bf16 %v785_v21, %v785_v21 }
 0x10d   : > { %626 = vst.msk [vmem:[%s1212_s10 + $0x14] sm:$0xf] %vm620_vm0, %v748_v22 }
 0x113   : > { %v774_v25 = vpop.f32.mrb[4].mxu0 }
 0x114   : > { %v775_v26 = vpop.f32.mrb[5].mxu0 }
 0x115   : > { %v776_v27 = vadd.f32 %v775_v26, %v774_v25  ;;  %v777_v28 = vpop.f32.mrb[6].mxu0 }
 0x116   : > { %v778_v30 = vpop.f32.mrb[7].mxu0 }
 0x117   : > { %v745_v31 = vpack.c.bf16 %v776_v27, %v776_v27  ;;  %v779_v32 = vadd.f32 %v778_v30, %v777_v28 }
 0x118   : > { %v786_v24 = vpop.f32.mrb[4].mxu1 }
 0x119   : > { %623 = vst.msk [vmem:[%s1212_s10 + $0x8] sm:$0xf] %vm620_vm0, %v745_v31  ;;  %v787_v33 = vpop.f32.mrb[5].mxu1  ;;  %v746_v34 = vpack.c.bf16 %v779_v32, %v779_v32 }
 0x11a   : > { %v788_v36 = vadd.f32 %v787_v33, %v786_v24  ;;  %v789_v37 = vpop.f32.mrb[6].mxu1 }
 0x11b   : > { %624 = vst.msk [vmem:[%s1212_s10 + $0xc] sm:$0xf] %vm620_vm0, %v746_v34  ;;  %v790_v38 = vpop.f32.mrb[7].mxu1 }
 0x11c   : > { %v749_v61 = vpack.c.bf16 %v788_v36, %v788_v36  ;;  %v791_v42 = vadd.f32 %v790_v38, %v789_v37 }
 0x11e   : > { %627 = vst.msk [vmem:[%s1212_s10 + $0x18] sm:$0xf] %vm620_vm0, %v749_v61  ;;  %v750_v40 = vpack.c.bf16 %v791_v42, %v791_v42 }
 0x120   : > { %628 = vst.msk [vmem:[%s1212_s10 + $0x1c] sm:$0xf] %vm620_vm0, %v750_v40 }
 0x121   : > { %878 = shalt.err (!%p875_p3)
}
 0x122   : > { %s879_s30 = scalar_lea.hbm %s1231_s20, 512  ;;  %s883_s29 = scalar_lea.hbm %s1286_s4, 1024 }
 0x123   : > { %p880_p4 = scmp.ne.s32.totalorder %s1231_s20, %s879_s30  ;;  %p884_p9 = scmp.lt.u32.totalorder %s1231_s20, %s1286_s4 }
 0x124   : > { %p885_p10 = scmp.lt.u32.totalorder %s883_s29, %s879_s30  ;;  %p887_p12 = scmp.lt.u32.totalorder %s879_s30, %s1231_s20 }
 0x125   : > { %p881_p7 = pnand %p880_p4, %p995_p5 }
 0x126   : > { %p886_p11 = por %p885_p10, %p884_p9 }
 0x127   : > { %p882_p8 = pneg %p881_p7 }
 0x128   : > { %p888_p13 = por %p887_p12, %p886_p11 }
 0x12a   : > { %p889_p0 = pnand %p888_p13, %p882_p8 }
 0x12c   : > { %892 = shalt.err (!%p889_p0)
}
 0x12d   : > { %s930_s9 = smov 64   ;;  %s931_s10 = smov 4  }
 0x12e   : > { %808 = dma.vmem_to_hbm [thread:$0]  (%p995_p5), %s1233_s12, 512, %s1231_s20, %s1241_s19, %s930_s9, %s930_s9, %s931_s10  }
 0x12f PF: > { %p814_p1 = scmp.ge.s32.totalorder %s927_s18, 2  ;;  %s658_s11 = sand.u32 1, %s915_s15  }
 0x130   : > { %s659_s13 = scalar_lea.sflag [#allocation3], %s658_s11 }
 0x131   : > { %p811_p2 = pnand %p814_p1, %p999_p6 }
 0x133   : > { %910 = dma.done.wait (!%p811_p2), %s659_s13, 512  }
 0x134   : > { %912 = vsyncadd (!%p811_p2), %s659_s13, 4294966784  ;;  %p14_p3 = scmp.ge.s32.totalorder %s982_s21, 4   ;;  %s1289_s15 = smov %s919_s16 }
 0x135   : > { %s1290_s16 = smov %s923_s17  ;;  %s1291_s17 = smov %s993_s24 }
 0x136   : > { %s1292_s18 = smov %s982_s21  ;;  %16 = sbr.rel (!%p14_p3) target bundleno = 3 (0x3), region = 71 }
 0x13d   :  { %664 = vsyncpa [#allocation3], 1 }
 0x13e   :  { %666 = vsyncpa [#allocation3 + $0x1], 1 }

</bundles_post_ra>
